<compile_context>
chip_gen: v7x
topology: tpu7x:2x2x1
jax: 0.10.0
libtpu: 0.0.40
codegen_flags: <defaults>
</compile_context>

<pallas_src>
import jax
import jax.numpy as jnp
from jax import lax
from jax.experimental import pallas as pl
from jax.experimental.pallas import tpu as pltpu


def _dfc_kernel(x_ref,
                w1T_ref, b1_ref,
                w2T_ref, b2_ref,
                w3T_ref, b3_ref,
                w4T_ref, b4_ref,
                oT_ref):
    """x tile is (tb, input_dim); activations are (features, tb) from layer 1 on."""

    def leaky_relu(h, slope=0.01):
        # max(h, 0.01*h): one vmax per vreg instead of vcmp+vsel.
        return jnp.maximum(h, slope * h)

    def layer(h, wT_ref, b_ref):
        # (out, in) @ (in, tb) + (out, 1) -> (out, tb); bias broadcasts on lanes.
        return jnp.dot(wT_ref[...], h, preferred_element_type=jnp.float32) + b_ref[...]

    # Layer 1: contract x's feature axis against W1^T's feature axis:
    # (h1, in) x (tb, in) -> (h1, tb).  No host-side transpose needed; batch
    # lands on the 128-lane axis for every subsequent op.
    h = lax.dot_general(
        w1T_ref[...], x_ref[...],
        dimension_numbers=(((1,), (1,)), ((), ())),
        preferred_element_type=jnp.float32) + b1_ref[...]
    h = leaky_relu(h)
    h = leaky_relu(layer(h, w2T_ref, b2_ref))
    h = leaky_relu(layer(h, w3T_ref, b3_ref))
    z = layer(h, w4T_ref, b4_ref)                       # (1, tb), lane-dense
    oT_ref[...] = pl.reciprocal(1.0 + jnp.exp(-z))      # sigmoid (exact recip)


def _round_up(n, m):
    return ((n + m - 1) // m) * m


def _choose_tb(B, input_dim, *, vmem_budget_bytes=12 << 20):
    """Batch-tile (lane) width per grid step, multiple of 256.

    Caps the double-buffered input-tile footprint (2 * tb * input_dim * 4 B)
    to ~12 MiB so it fits every generation's scoped-VMEM default, uses big
    tiles for large B to amortize per-step overhead, and keeps >=4 grid blocks
    when B is large so v7x's two TensorCores both get work.
    """
    cap = max(256, ((vmem_budget_bytes // (8 * input_dim)) // 256) * 256)
    if B <= 2048:
        tb = _round_up(B, 256)
    else:
        tb = 2048
        while tb > 256 and pl.cdiv(B, tb) < 4:
            tb //= 2
    return int(min(tb, cap))


def dfc_discriminator_forward(x, params, *, tb=None):
    """x: (B, input_dim) float32. params: list of (W, b) with W shape (in, out)."""
    B, input_dim = x.shape
    (w1, b1), (w2, b2), (w3, b3), (w4, b4) = params

    if tb is None:
        tb = _choose_tb(B, input_dim)
    num_blocks = pl.cdiv(B, tb)
    B_pad = num_blocks * tb
    if B_pad != B:
        # Pad only the trailing rows (tiny); padded rows are computed & discarded.
        x = jnp.pad(x, ((0, B_pad - B), (0, 0)))

    # Weights as (out, in); biases as (out, 1) so they broadcast along lanes.
    w1T, w2T, w3T, w4T = w1.T, w2.T, w3.T, w4.T
    bc = lambda b: b.reshape(-1, 1)
    b1c, b2c, b3c, b4c = bc(b1), bc(b2), bc(b3), bc(b4)

    # Weights/biases: full-array blocks, constant index_map -> VMEM-resident.
    full = lambda a: pl.BlockSpec(a.shape, lambda i: (0,) * a.ndim)

    h1, h2, h3 = w1.shape[1], w2.shape[1], w3.shape[1]
    flops = 2 * B_pad * (input_dim * h1 + h1 * h2 + h2 * h3 + h3 * 1)
    bytes_accessed = 4 * (B_pad * input_dim + B_pad) + sum(
        4 * (wi.size + bi.size) for wi, bi in params)

    out = pl.pallas_call(
        _dfc_kernel,
        out_shape=jax.ShapeDtypeStruct((1, B_pad), jnp.float32),
        grid=(num_blocks,),
        in_specs=[pl.BlockSpec((tb, input_dim), lambda i: (i, 0)),  # contiguous slab
                  full(w1T), full(b1c),
                  full(w2T), full(b2c),
                  full(w3T), full(b3c),
                  full(w4T), full(b4c)],
        out_specs=pl.BlockSpec((1, tb), lambda i: (0, i)),
        compiler_params=pltpu.CompilerParams(
            dimension_semantics=("parallel",)),
        cost_estimate=pl.CostEstimate(
            flops=flops, transcendentals=B_pad, bytes_accessed=bytes_accessed),
    )(x, w1T, b1c, w2T, b2c, w3T, b3c, w4T, b4c)

    # torch.squeeze removes all size-1 dims: (B, 1) -> (B,), scalar if B == 1.
    return jnp.squeeze(out[0, :B])


def init_params(key, input_dim, layer_size=(10, 10, 10)):
    """Deterministic synthetic init (uniform bound 1/sqrt(fan_in), like PyTorch)."""
    dims = [input_dim] + list(layer_size) + [1]
    params = []
    for i in range(len(dims) - 1):
        key, kw, kb = jax.random.split(key, 3)
        fan_in = dims[i]
        bound = 1.0 / jnp.sqrt(fan_in)
        w = jax.random.uniform(kw, (dims[i], dims[i + 1]), jnp.float32, -bound, bound)
        b = jax.random.uniform(kb, (1, dims[i + 1]), jnp.float32, -bound, bound)
        params.append((w, b))
    return params


def reference_forward(x, params):
    """Pure-JAX reference of the PyTorch module forward."""
    h = x
    for i, (w, b) in enumerate(params):
        h = h @ w + b
        if i < len(params) - 1:
            h = jnp.where(h >= 0, h, 0.01 * h)
        else:
            h = jax.nn.sigmoid(h)
    return jnp.squeeze(h)


if __name__ == "__main__":
    key = jax.random.PRNGKey(0)
    B, input_dim = 8, 32
    kx, kp = jax.random.split(key)
    x = jax.random.normal(kx, (B, input_dim), jnp.float32)
    params = init_params(kp, input_dim, layer_size=(10, 10, 10))

    out = jax.block_until_ready(dfc_discriminator_forward(x, params))
    ref = reference_forward(x, params)
    assert out.shape == (B,), out.shape
    assert jnp.allclose(out, ref, atol=1e-5, rtol=1e-5), (out, ref)

    # Non-multiple-of-tile batch: exercises the (tiny) tail-row pad path.
    B2 = 300
    x2 = jax.random.normal(jax.random.PRNGKey(1), (B2, input_dim), jnp.float32)
    out2 = jax.block_until_ready(dfc_discriminator_forward(x2, params))
    ref2 = reference_forward(x2, params)
    assert out2.shape == (B2,), out2.shape
    assert jnp.allclose(out2, ref2, atol=1e-5, rtol=1e-5)

    # Larger batch: exercises the multi-block "parallel" grid path.
    B3 = 2100
    x3 = jax.random.normal(jax.random.PRNGKey(2), (B3, input_dim), jnp.float32)
    out3 = jax.block_until_ready(dfc_discriminator_forward(x3, params))
    ref3 = reference_forward(x3, params)
    assert out3.shape == (B3,), out3.shape
    assert jnp.allclose(out3, ref3, atol=1e-5, rtol=1e-5)

    print("KERNEL_OK")
</pallas_src>

<mosaic_0001>
module attributes {stable_mosaic.version = 11 : i64} {
  func.func @_dfc_kernel(%arg0: i32, %arg1: memref<256x32xf32, #tpu.memory_space<vmem>>, %arg2: memref<10x32xf32, #tpu.memory_space<vmem>>, %arg3: memref<10x1xf32, #tpu.memory_space<vmem>>, %arg4: memref<10x10xf32, #tpu.memory_space<vmem>>, %arg5: memref<10x1xf32, #tpu.memory_space<vmem>>, %arg6: memref<10x10xf32, #tpu.memory_space<vmem>>, %arg7: memref<10x1xf32, #tpu.memory_space<vmem>>, %arg8: memref<1x10xf32, #tpu.memory_space<vmem>>, %arg9: memref<1x1xf32, #tpu.memory_space<vmem>>, %arg10: memref<1x256xf32, #tpu.memory_space<vmem>>) attributes {dimension_semantics = [#tpu.dimension_semantics<parallel>], iteration_bounds = array<i64: 1>, scalar_prefetch = 0 : i64, scratch_operands = 0 : i64, tpu.core_type = #tpu.core_type<tc>, window_params = [{transform_indices = @transform_0, window_bounds = array<i64: 256, 32>}, {pipeline_mode = #tpu.pipeline_mode<synchronous>, transform_indices = @transform_1, window_bounds = array<i64: 10, 32>}, {pipeline_mode = #tpu.pipeline_mode<synchronous>, transform_indices = @transform_2, window_bounds = array<i64: 10, 1>}, {pipeline_mode = #tpu.pipeline_mode<synchronous>, transform_indices = @transform_3, window_bounds = array<i64: 10, 10>}, {pipeline_mode = #tpu.pipeline_mode<synchronous>, transform_indices = @transform_4, window_bounds = array<i64: 10, 1>}, {pipeline_mode = #tpu.pipeline_mode<synchronous>, transform_indices = @transform_5, window_bounds = array<i64: 10, 10>}, {pipeline_mode = #tpu.pipeline_mode<synchronous>, transform_indices = @transform_6, window_bounds = array<i64: 10, 1>}, {pipeline_mode = #tpu.pipeline_mode<synchronous>, transform_indices = @transform_7, window_bounds = array<i64: 1, 10>}, {pipeline_mode = #tpu.pipeline_mode<synchronous>, transform_indices = @transform_8, window_bounds = array<i64: 1, 1>}, {transform_indices = @transform_9, window_bounds = array<i64: 1, 256>}]} {
    %c0 = arith.constant 0 : index
    %c0_0 = arith.constant 0 : index
    %0 = vector.load %arg2[%c0, %c0_0] : memref<10x32xf32, #tpu.memory_space<vmem>>, vector<10x32xf32>
    %c0_1 = arith.constant 0 : index
    %c0_2 = arith.constant 0 : index
    %1 = vector.load %arg1[%c0_1, %c0_2] : memref<256x32xf32, #tpu.memory_space<vmem>>, vector<256x32xf32>
    %cst = arith.constant dense<0.000000e+00> : vector<10x256xf32>
    %2 = tpu.matmul %0, %1, %cst {dimension_numbers = #tpu.dot_dimension_numbers<[1], [1], [0], [0], [0, 0, 1, 0], [], []>} : vector<10x32xf32>, vector<256x32xf32>, vector<10x256xf32> -> vector<10x256xf32>
    %c0_3 = arith.constant 0 : index
    %c0_4 = arith.constant 0 : index
    %3 = vector.load %arg3[%c0_3, %c0_4] : memref<10x1xf32, #tpu.memory_space<vmem>>, vector<10x1xf32>
    %4 = vector.broadcast %3 : vector<10x1xf32> to vector<10x256xf32>
    %5 = arith.addf %2, %4 : vector<10x256xf32>
    %cst_5 = arith.constant 0.00999999977 : f32
    %6 = vector.broadcast %cst_5 : f32 to vector<10x256xf32>
    %7 = arith.mulf %6, %5 : vector<10x256xf32>
    %8 = arith.maximumf %5, %7 : vector<10x256xf32>
    %c0_6 = arith.constant 0 : index
    %c0_7 = arith.constant 0 : index
    %9 = vector.load %arg4[%c0_6, %c0_7] : memref<10x10xf32, #tpu.memory_space<vmem>>, vector<10x10xf32>
    %cst_8 = arith.constant dense<0.000000e+00> : vector<10x256xf32>
    %10 = tpu.matmul %9, %8, %cst_8 {dimension_numbers = #tpu.dot_dimension_numbers<[1], [0], [0], [1], [0, 0, 1, 1], [], []>} : vector<10x10xf32>, vector<10x256xf32>, vector<10x256xf32> -> vector<10x256xf32>
    %c0_9 = arith.constant 0 : index
    %c0_10 = arith.constant 0 : index
    %11 = vector.load %arg5[%c0_9, %c0_10] : memref<10x1xf32, #tpu.memory_space<vmem>>, vector<10x1xf32>
    %12 = vector.broadcast %11 : vector<10x1xf32> to vector<10x256xf32>
    %13 = arith.addf %10, %12 : vector<10x256xf32>
    %cst_11 = arith.constant 0.00999999977 : f32
    %14 = vector.broadcast %cst_11 : f32 to vector<10x256xf32>
    %15 = arith.mulf %14, %13 : vector<10x256xf32>
    %16 = arith.maximumf %13, %15 : vector<10x256xf32>
    %c0_12 = arith.constant 0 : index
    %c0_13 = arith.constant 0 : index
    %17 = vector.load %arg6[%c0_12, %c0_13] : memref<10x10xf32, #tpu.memory_space<vmem>>, vector<10x10xf32>
    %cst_14 = arith.constant dense<0.000000e+00> : vector<10x256xf32>
    %18 = tpu.matmul %17, %16, %cst_14 {dimension_numbers = #tpu.dot_dimension_numbers<[1], [0], [0], [1], [0, 0, 1, 1], [], []>} : vector<10x10xf32>, vector<10x256xf32>, vector<10x256xf32> -> vector<10x256xf32>
    %c0_15 = arith.constant 0 : index
    %c0_16 = arith.constant 0 : index
    %19 = vector.load %arg7[%c0_15, %c0_16] : memref<10x1xf32, #tpu.memory_space<vmem>>, vector<10x1xf32>
    %20 = vector.broadcast %19 : vector<10x1xf32> to vector<10x256xf32>
    %21 = arith.addf %18, %20 : vector<10x256xf32>
    %cst_17 = arith.constant 0.00999999977 : f32
    %22 = vector.broadcast %cst_17 : f32 to vector<10x256xf32>
    %23 = arith.mulf %22, %21 : vector<10x256xf32>
    %24 = arith.maximumf %21, %23 : vector<10x256xf32>
    %c0_18 = arith.constant 0 : index
    %c0_19 = arith.constant 0 : index
    %25 = vector.load %arg8[%c0_18, %c0_19] : memref<1x10xf32, #tpu.memory_space<vmem>>, vector<1x10xf32>
    %cst_20 = arith.constant dense<0.000000e+00> : vector<1x256xf32>
    %26 = tpu.matmul %25, %24, %cst_20 {dimension_numbers = #tpu.dot_dimension_numbers<[1], [0], [0], [1], [0, 0, 1, 1], [], []>} : vector<1x10xf32>, vector<10x256xf32>, vector<1x256xf32> -> vector<1x256xf32>
    %c0_21 = arith.constant 0 : index
    %c0_22 = arith.constant 0 : index
    %27 = vector.load %arg9[%c0_21, %c0_22] : memref<1x1xf32, #tpu.memory_space<vmem>>, vector<1x1xf32>
    %28 = vector.broadcast %27 : vector<1x1xf32> to vector<1x256xf32>
    %29 = arith.addf %26, %28 : vector<1x256xf32>
    %cst_23 = arith.constant 0.000000e+00 : f32
    %30 = vector.broadcast %cst_23 : f32 to vector<1x256xf32>
    %31 = arith.subf %30, %29 : vector<1x256xf32>
    %32 = math.exp %31 : vector<1x256xf32>
    %cst_24 = arith.constant 1.000000e+00 : f32
    %33 = vector.broadcast %cst_24 : f32 to vector<1x256xf32>
    %34 = arith.addf %33, %32 : vector<1x256xf32>
    %35 = tpu.reciprocal %34 : vector<1x256xf32> -> vector<1x256xf32>
    %c0_25 = arith.constant 0 : index
    %c0_26 = arith.constant 0 : index
    %36 = vector.load %arg10[%c0_25, %c0_26] : memref<1x256xf32, #tpu.memory_space<vmem>>, vector<1x256xf32>
    tpu.vector_store %arg10[%c0_25, %c0_26], %35 {strides = array<i32>} : memref<1x256xf32, #tpu.memory_space<vmem>>, vector<1x256xf32>,
    return
  }
  func.func @transform_0(%arg0: i32) -> (i32, i32) {
    %c0_i32 = arith.constant 0 : i32
    %c0_i32_0 = arith.constant 0 : i32
    return %arg0, %c0_i32 : i32, i32
  }
  func.func @transform_1(%arg0: i32) -> (i32, i32) {
    %c0_i32 = arith.constant 0 : i32
    %c0_i32_0 = arith.constant 0 : i32
    %c0_i32_1 = arith.constant 0 : i32
    return %c0_i32, %c0_i32_0 : i32, i32
  }
  func.func @transform_2(%arg0: i32) -> (i32, i32) {
    %c0_i32 = arith.constant 0 : i32
    %c0_i32_0 = arith.constant 0 : i32
    %c0_i32_1 = arith.constant 0 : i32
    return %c0_i32, %c0_i32_0 : i32, i32
  }
  func.func @transform_3(%arg0: i32) -> (i32, i32) {
    %c0_i32 = arith.constant 0 : i32
    %c0_i32_0 = arith.constant 0 : i32
    %c0_i32_1 = arith.constant 0 : i32
    return %c0_i32, %c0_i32_0 : i32, i32
  }
  func.func @transform_4(%arg0: i32) -> (i32, i32) {
    %c0_i32 = arith.constant 0 : i32
    %c0_i32_0 = arith.constant 0 : i32
    %c0_i32_1 = arith.constant 0 : i32
    return %c0_i32, %c0_i32_0 : i32, i32
  }
  func.func @transform_5(%arg0: i32) -> (i32, i32) {
    %c0_i32 = arith.constant 0 : i32
    %c0_i32_0 = arith.constant 0 : i32
    %c0_i32_1 = arith.constant 0 : i32
    return %c0_i32, %c0_i32_0 : i32, i32
  }
  func.func @transform_6(%arg0: i32) -> (i32, i32) {
    %c0_i32 = arith.constant 0 : i32
    %c0_i32_0 = arith.constant 0 : i32
    %c0_i32_1 = arith.constant 0 : i32
    return %c0_i32, %c0_i32_0 : i32, i32
  }
  func.func @transform_7(%arg0: i32) -> (i32, i32) {
    %c0_i32 = arith.constant 0 : i32
    %c0_i32_0 = arith.constant 0 : i32
    %c0_i32_1 = arith.constant 0 : i32
    return %c0_i32, %c0_i32_0 : i32, i32
  }
  func.func @transform_8(%arg0: i32) -> (i32, i32) {
    %c0_i32 = arith.constant 0 : i32
    %c0_i32_0 = arith.constant 0 : i32
    %c0_i32_1 = arith.constant 0 : i32
    return %c0_i32, %c0_i32_0 : i32, i32
  }
  func.func @transform_9(%arg0: i32) -> (i32, i32) {
    %c0_i32 = arith.constant 0 : i32
    %c0_i32_0 = arith.constant 0 : i32
    return %c0_i32, %arg0 : i32, i32
  }
}

</mosaic_0001>

<bundles_post_ra>
// kernel: tpu_custom_call.1
= control target key start
LH: loop header
LB: loop body
LE: loop exit
PB: predicated region body
PF: predicated region fallthrough
CT: control target
= control target key end

     0   :  { %s1090_s0 = inlined_call_operand.vmem [shape: f32[256,32], index: 0, kind: input, shape index: {}]   ;;  %s1091_s1 = inlined_call_operand.vmem [shape: f32[10,32], index: 1, kind: input, shape index: {}]   ;;  %s1092_s2 = inlined_call_operand.vmem [shape: f32[10,1], index: 2, kind: input, shape index: {}]   ;;  %s1093_s3 = inlined_call_operand.vmem [shape: f32[10,10], index: 3, kind: input, shape index: {}]   ;;  %s1094_s4 = inlined_call_operand.vmem [shape: f32[10,1], index: 4, kind: input, shape index: {}]   ;;  %s1095_s5 = inlined_call_operand.vmem [shape: f32[10,10], index: 5, kind: input, shape index: {}]   ;;  %s1096_s6 = inlined_call_operand.vmem [shape: f32[10,1], index: 6, kind: input, shape index: {}]   ;;  %s1097_s7 = inlined_call_operand.vmem [shape: f32[1,10], index: 7, kind: input, shape index: {}]   ;;  %s1098_s8 = inlined_call_operand.<no memory space> [shape: f32[1,1], index: 8, kind: input, shape index: {}]   ;;  %s1099_s9 = inlined_call_operand.hbm [shape: f32[1,256], index: 9, kind: output, shape index: {}]  }
   0x1   :  { %v14_v0 = vstv %s1098_s8 }
   0x2   :  { %15 = vst [vmem:[#allocation2] sm:$0x1] %v14_v0 }
   0x3   :  { %v53_v1 = vld [vmem:[%s1090_s0 + $0x80] sm:$0xff]  ;;  %v54_v2 = vld [vmem:[%s1090_s0 + $0x88] sm:$0xff]  ;;  %vm81_vm0 = vcmask 261120   ;;  %v55_v7 = vld [vmem:[%s1090_s0 + $0x90] sm:$0xff]  ;;  %v817_v8 = vmov 0  }
   0x4   :  { %v37_v3 = vld [vmem:[%s1090_s0] sm:$0xff]  ;;  %v712_v4 = vpack.c.bf16 %v54_v2, %v53_v1  ;;  %vm886_vm1 = vmpackc.low %vm81_vm0, %vm81_vm0  ;;  %v38_v6 = vld [vmem:[%s1090_s0 + $0x8] sm:$0xff]  ;;  %783 = vset.pattern.permute.xlu0 %v817_v8  ;;  %784 = vset.pattern.permute.xlu1 %v817_v8 }
   0x5   :  { %v715_v9 = vpack.c.bf16 %v38_v6, %v37_v3  ;;  %v56_v10 = vld [vmem:[%s1090_s0 + $0x98] sm:$0xff]  ;;  %v39_v12 = vld [vmem:[%s1090_s0 + $0x10] sm:$0xff]  ;;  %v57_v14 = vld [vmem:[%s1090_s0 + $0xa0] sm:$0xff] }
   0x6   :  { %714 = vmatprep.subr.msk.bf16.mxu0 %vm886_vm1, %v712_v4  ;;  %v718_v11 = vpack.c.bf16 %v56_v10, %v55_v7  ;;  %v40_v13 = vld [vmem:[%s1090_s0 + $0x18] sm:$0xff]  ;;  %v58_v15 = vld [vmem:[%s1090_s0 + $0xa8] sm:$0xff]  ;;  %v35_v18 = vld [vmem:[%s1091_s1] sm:$0xff] }
   0x7   :  { %717 = vmatpush3.bf16.xpose.msk.msra.mxu0 %vm886_vm1, %v715_v9  ;;  %v721_v16 = vpack.c.bf16 %v40_v13, %v39_v12  ;;  %v724_v17 = vpack.c.bf16 %v58_v15, %v57_v14  ;;  %v69_v19 = vld [vmem:[%s1092_s2] sm:$0xff]  ;;  %708 = vmatprep.mubr.msk.f32.mxu0 %vm81_vm0, %v35_v18  ;;  %v42_v21 = vld [vmem:[%s1090_s0 + $0x28] sm:$0xff] }
   0x8   :  { %720 = vmatprep.subr.msk.bf16.mxu0 %vm886_vm1, %v718_v11  ;;  %v41_v20 = vld [vmem:[%s1090_s0 + $0x20] sm:$0xff]  ;;  %73 = vperm.xlu0 %783, %v69_v19  }
   0xf   :  { %723 = vmatpush3.bf16.xpose.msk.msra.mxu0 %vm886_vm1, %v721_v16 }
  0x10   :  { %726 = vmatprep.subr.msk.bf16.mxu0 %vm886_vm1, %v724_v17 }
  0x11   :  { %16 = vsyncpa [#allocation4], 0  ;;  %v59_v22 = vld [vmem:[%s1090_s0 + $0xb0] sm:$0xff]  ;;  %v60_v23 = vld [vmem:[%s1090_s0 + $0xb8] sm:$0xff]  ;;  %v727_v25 = vpack.c.bf16 %v42_v21, %v41_v20  ;;  %v818_v57 = vmov 0.0   ;;  %vm290_vm2 = vcmask 1041408  }
  0x12   :  { %v70_v24 = vld [vmem:[%s1092_s2 + $0x8] sm:$0x3]  ;;  %v730_v26 = vpack.c.bf16 %v60_v23, %v59_v22  ;;  %v384_v27 = vld [vmem:[%s1096_s6] sm:$0xff]  ;;  %v43_v28 = vld [vmem:[%s1090_s0 + $0x30] sm:$0xff]  ;;  %361 = vmatprep.mubr.f32.mxu1 %v818_v57  ;;  %vm819_vm3 = vmmov 1   ;;  %vm283_vm5 = vcmask 80896  }
  0x13   :  { %78 = vperm.xlu0 %783, %v70_v24   ;;  %v44_v29 = vld [vmem:[%s1090_s0 + $0x38] sm:$0xff]  ;;  %v61_v30 = vld [vmem:[%s1090_s0 + $0xc0] sm:$0xff]  ;;  %v62_v31 = vld [vmem:[%s1090_s0 + $0xc8] sm:$0xff] }
  0x14   :  { %v494_v32 = vld [vmem:[#allocation2] sm:$0x1]  ;;  %v733_v33 = vpack.c.bf16 %v44_v29, %v43_v28  ;;  %v736_v34 = vpack.c.bf16 %v62_v31, %v61_v30  ;;  %v46_v36 = vld [vmem:[%s1090_s0 + $0x48] sm:$0xff]  ;;  %v63_v37 = vld [vmem:[%s1090_s0 + $0xd0] sm:$0xff] }
  0x15   :  { %v45_v35 = vld [vmem:[%s1090_s0 + $0x40] sm:$0xff]  ;;  %v64_v38 = vld [vmem:[%s1090_s0 + $0xd8] sm:$0xff]  ;;  %v47_v41 = vld [vmem:[%s1090_s0 + $0x50] sm:$0xff] }
  0x16   :  { %v739_v39 = vpack.c.bf16 %v46_v36, %v45_v35  ;;  %v742_v40 = vpack.c.bf16 %v64_v38, %v63_v37  ;;  %v48_v42 = vld [vmem:[%s1090_s0 + $0x58] sm:$0xff]  ;;  %v65_v43 = vld [vmem:[%s1090_s0 + $0xe0] sm:$0xff]  ;;  %v66_v44 = vld [vmem:[%s1090_s0 + $0xe8] sm:$0xff] }
  0x17   :  { %729 = vmatpush3.bf16.xpose.msk.msra.mxu0 %vm886_vm1, %v727_v25  ;;  %388 = vperm.xlu0 %783, %v384_v27   ;;  %v745_v45 = vpack.c.bf16 %v48_v42, %v47_v41  ;;  %v748_v46 = vpack.c.bf16 %v66_v44, %v65_v43  ;;  %v49_v47 = vld [vmem:[%s1090_s0 + $0x60] sm:$0xff]  ;;  %v50_v48 = vld [vmem:[%s1090_s0 + $0x68] sm:$0xff]  ;;  %v67_v49 = vld [vmem:[%s1090_s0 + $0xf0] sm:$0xff] }
  0x18   :  { %732 = vmatprep.subr.msk.bf16.mxu0 %vm886_vm1, %v730_v26  ;;  %v68_v50 = vld [vmem:[%s1090_s0 + $0xf8] sm:$0xff]  ;;  %v751_v51 = vpack.c.bf16 %v50_v48, %v49_v47  ;;  %v51_v53 = vld [vmem:[%s1090_s0 + $0x70] sm:$0xff]  ;;  %v36_v56 = vld [vmem:[%s1091_s1 + $0x8] sm:$0x3] }
  0x19   :  { %v754_v52 = vpack.c.bf16 %v68_v50, %v67_v49  ;;  %v52_v54 = vld [vmem:[%s1090_s0 + $0x78] sm:$0xff]  ;;  %v271_v58 = vld [vmem:[%s1094_s4] sm:$0xff]  ;;  %v272_v59 = vld [vmem:[%s1094_s4 + $0x8] sm:$0x3] }
  0x1a   :  { %v757_v55 = vpack.c.bf16 %v52_v54, %v51_v53  ;;  %275 = vperm.xlu1 %784, %v271_v58   ;;  %v385_v60 = vld [vmem:[%s1096_s6 + $0x8] sm:$0x3]  ;;  %vm1038_vm4 = vmpackc.low %vm290_vm2, %vm819_vm3 }
  0x1b   :  { %497 = vperm.xlu0 %783, %v494_v32   ;;  %v270_v19 = vld [vmem:[%s1093_s3 + $0x8] sm:$0x3] }
  0x1c   :  { %v383_v41 = vld [vmem:[%s1095_s5 + $0x8] sm:$0x3] }
  0x1e   :  { %280 = vperm.xlu1 %784, %v272_v59  }
  0x1f   :  { %735 = vmatpush3.bf16.xpose.msk.msra.mxu0 %vm886_vm1, %v733_v33 }
  0x20   :  { %738 = vmatprep.subr.msk.bf16.mxu0 %vm886_vm1, %v736_v34 }
  0x22   :  { %393 = vperm.xlu1 %784, %v385_v60  }
  0x27   :  { %741 = vmatpush3.bf16.xpose.msk.msra.mxu0 %vm886_vm1, %v739_v39 }
  0x28   :  { %744 = vmatprep.subr.msk.bf16.mxu0 %vm886_vm1, %v742_v40  ;;  %v382_v40 = vld [vmem:[%s1095_s5] sm:$0xff] }
  0x2f   :  { %747 = vmatpush3.bf16.xpose.msk.msra.mxu0 %vm886_vm1, %v745_v45 }
  0x30   :  { %750 = vmatprep.subr.msk.bf16.mxu0 %vm886_vm1, %v748_v46 }
  0x37   :  { %753 = vmatpush3.bf16.xpose.msk.msra.mxu0 %vm886_vm1, %v751_v51 }
  0x38   :  { %756 = vmatprep.subr.msk.bf16.mxu0 %vm886_vm1, %v754_v52 }
  0x3f   :  { %759 = vmatpush3.bf16.xpose.msk.msra.mxu0 %vm886_vm1, %v757_v55 }
  0x46   :  { %709 = vmatmul.mubr.msk.f32.vlgmr.msra.gmra.mrb[0].mxu0 %vm81_vm0, %v35_v18  ;;  %v269_v18 = vld [vmem:[%s1093_s3] sm:$0xff] }
  0x47   :  { %710 = vmatprep.mubr.msk.f32.mxu0 %vm81_vm0, %v36_v56 }
  0x4a   :  { %711 = vmatmul.mubr.msk.f32.gmra.mrb[2].mxu0 %vm81_vm0, %v36_v56 }
  0x87   :  { %v74_v61 = vpop.permute.xlu0 %73 }
  0x92   :  { %v79_v2 = vpop.permute.xlu0 %78 }
  0x96   :  { %v389_v42 = vpop.permute.xlu0 %388 }
  0x99   :  { %v276_v20 = vpop.permute.xlu1 %275 }
  0x9d   :  { %v281_v25 = vpop.permute.xlu1 %280 }
  0xa1   :  { %v394_v47 = vpop.permute.xlu1 %393 }
 0x119   :  { %v250_v62 = vpop.f32.mrb[0].mxu0 }
 0x11a   :  { %v251_v63 = vadd.f32 %v250_v62, %v74_v61  ;;  %v252_v0 = vpop.f32.mrb[1].mxu0  ;;  %v493_v62 = vld [vmem:[%s1097_s7] sm:$0x1]  ;;  %s821_s7 = smov [#allocation3]  }
 0x11b   :  { %v253_v1 = vadd.f32 %v252_v0, %v74_v61  ;;  %s623_s26 = sshll.u32 %s821_s7, 4  ;;  %s624_s26 = int_to_ptr.vmem [resolvable:$true] %s623_s26 }
 0x11c   :  { %v261_v4 = vmul.f32 0.01, %v251_v63  ;;  %s793_s27 = scalar_lea.vmem %s624_s26, 32  ;;  %p798_p1 = scmp.lt.s32.totalorder %s624_s26, %s624_s26 }
 0x11d   :  { %v256_v3 = vpop.f32.mrb[2].mxu0  ;;  %v262_v7 = vmul.f32 0.01, %v253_v1  ;;  %p794_p0 = scmp.ne.s32.totalorder %s624_s26, %s793_s27  ;;  %p799_p2 = scmp.lt.s32.totalorder %s793_s27, %s793_s27 }
 0x11e   :  { %v257_v5 = vadd.f32 %v256_v3, %v79_v2  ;;  %v258_v6 = vpop.f32.mrb[3].mxu0  ;;  %v265_v11 = vmax.f32 %v251_v63, %v261_v4  ;;  %v500_v63 = vlaneseq }
 0x11f   :  { %v259_v8 = vadd.f32 %v258_v6, %v79_v2  ;;  %v266_v13 = vmax.f32 %v253_v1, %v262_v7  ;;  %v498_v2 = vpop.permute.xlu0 %497  ;;  %p800_p3 = por %p799_p2, %p798_p1 }
 0x120   :  { %v263_v9 = vmul.f32 0.01, %v257_v5  ;;  %v501_v0 = vshrl.u32 %v500_v63, 7  ;;  %vm614_vm6 = vcmp.lt.s32.totalorder %v500_v63, 256 }
 0x121   :  { %v264_v10 = vmul.f32 0.01, %v259_v8  ;;  %p801_p4 = pnand %p800_p3, %p794_p0 }
 0x122   :  { %v267_v12 = vmax.f32 %v257_v5, %v263_v9  ;;  %v502_v1 = vsub.s32 0, %v501_v0 }
 0x123   :  { %v268_v14 = vmax.f32 %v259_v8, %v264_v10 }
 0x124   :  { %v763_v16 = vpack.c.bf16 %v267_v12, %v265_v11  ;;  %v503_v3 = vrot.slane %v498_v2, %v502_v1 }
 0x125   :  { %v760_v17 = vpack.c.bf16 %v268_v14, %v266_v13 }
 0x127   :  { %762 = vmatprep.subr.msk.bf16.mxu1 %vm1038_vm4, %v760_v17 }
 0x128   :  { %765 = vmatpush1.bf16.msk.msra.mxu1 %vm1038_vm4, %v763_v16  ;;  %v820_v16 = vmov 1966171168  }
 0x129   :  { %v598_v17 = vunpack.c.l.s4 %v820_v16 }
 0x12b   :  { %667 = vmatmul.mubr.msk.f32.vlgmr.msra.gmra.mrb[0].mxu1 %vm283_vm5, %v269_v18  ;;  %v599_v18 = vunpack.c.0.s8 %v598_v17 }
 0x12c   :  { %367 = vmatprep.mubr.f32.mxu1 %v818_v57 }
 0x12f   :  { %668 = vmatmul.mubr.msk.f32.gmra.mrb[2].mxu1 %vm283_vm5, %v270_v19 }
 0x130   :  { %472 = vmatprep.mubr.f32.mxu1 %v818_v57 }
 0x1fe   :  { %v363_v21 = vpop.f32.mrb[0].mxu1 }
 0x1ff   :  { %v364_v22 = vadd.f32 %v363_v21, %v276_v20  ;;  %v365_v23 = vpop.f32.mrb[1].mxu1 }
 0x200   :  { %v366_v24 = vadd.f32 %v365_v23, %v276_v20  ;;  %v602_v20 = vsub.s32 %v599_v18, %v501_v0 }
 0x201   :  { %v374_v27 = vmul.f32 0.01, %v364_v22 }
 0x202   :  { %v369_v26 = vpop.f32.mrb[2].mxu1  ;;  %v375_v30 = vmul.f32 0.01, %v366_v24 }
 0x203   :  { %v370_v28 = vadd.f32 %v369_v26, %v281_v25  ;;  %v371_v29 = vpop.f32.mrb[3].mxu1  ;;  %v378_v34 = vmax.f32 %v364_v22, %v374_v27 }
 0x204   :  { %v372_v31 = vadd.f32 %v371_v29, %v281_v25  ;;  %v379_v36 = vmax.f32 %v366_v24, %v375_v30 }
 0x205   :  { %v376_v32 = vmul.f32 0.01, %v370_v28 }
 0x206   :  { %v377_v33 = vmul.f32 0.01, %v372_v31 }
 0x207   :  { %v380_v35 = vmax.f32 %v370_v28, %v376_v32 }
 0x208   :  { %v381_v37 = vmax.f32 %v372_v31, %v377_v33 }
 0x209   :  { %v769_v38 = vpack.c.bf16 %v380_v35, %v378_v34 }
 0x20a   :  { %v766_v39 = vpack.c.bf16 %v381_v37, %v379_v36 }
 0x20c   :  { %768 = vmatprep.subr.msk.bf16.mxu1 %vm1038_vm4, %v766_v39 }
 0x20d   :  { %771 = vmatpush1.bf16.msk.msra.mxu1 %vm1038_vm4, %v769_v38 }
 0x210   :  { %671 = vmatmul.mubr.msk.f32.vlgmr.msra.gmra.mrb[4].mxu1 %vm283_vm5, %v382_v40 }
 0x211   :  { %478 = vmatprep.mubr.f32.mxu1 %v818_v57 }
 0x214   :  { %672 = vmatmul.mubr.msk.f32.gmra.mrb[6].mxu1 %vm283_vm5, %v383_v41 }
 0x215   :  { %577 = vmatprep.mubr.f32.mxu1 %v818_v57 }
 0x2e3   :  { %v474_v43 = vpop.f32.mrb[4].mxu1 }
 0x2e4   :  { %v475_v44 = vadd.f32 %v474_v43, %v389_v42  ;;  %v476_v45 = vpop.f32.mrb[5].mxu1 }
 0x2e5   :  { %v477_v46 = vadd.f32 %v476_v45, %v389_v42 }
 0x2e6   :  { %v485_v49 = vmul.f32 0.01, %v475_v44 }
 0x2e7   :  { %v480_v48 = vpop.f32.mrb[6].mxu1  ;;  %v486_v52 = vmul.f32 0.01, %v477_v46 }
 0x2e8   :  { %v481_v50 = vadd.f32 %v480_v48, %v394_v47  ;;  %v482_v51 = vpop.f32.mrb[7].mxu1  ;;  %v489_v56 = vmax.f32 %v475_v44, %v485_v49 }
 0x2e9   :  { %v483_v53 = vadd.f32 %v482_v51, %v394_v47  ;;  %v490_v59 = vmax.f32 %v477_v46, %v486_v52 }
 0x2ea   :  { %v487_v54 = vmul.f32 0.01, %v481_v50 }
 0x2eb   :  { %v488_v55 = vmul.f32 0.01, %v483_v53 }
 0x2ec   :  { %v491_v58 = vmax.f32 %v481_v50, %v487_v54 }
 0x2ed   :  { %v492_v60 = vmax.f32 %v483_v53, %v488_v55 }
 0x2ee   :  { %v775_v61 = vpack.c.bf16 %v491_v58, %v489_v56 }
 0x2ef   :  { %v772_v57 = vpack.c.bf16 %v492_v60, %v490_v59 }
 0x2f1   :  { %774 = vmatprep.subr.msk.bf16.mxu1 %vm1038_vm4, %v772_v57 }
 0x2f2   :  { %777 = vmatpush1.bf16.msk.msra.mxu1 %vm1038_vm4, %v775_v61 }
 0x2f5   :  { %675 = vmatmul.mubr.msk.f32.vlgmr.msra.gmra.mrb[8].mxu1 %vm283_vm5, %v493_v62 }
 0x3c8   :  { %v579_v4 = vpop.f32.mrb[8].mxu1 }
 0x3c9   :  { %v580_v5 = vadd.f32 %v579_v4, %v503_v3  ;;  %v581_v6 = vpop.f32.mrb[9].mxu1 }
 0x3ca   :  { %v582_v7 = vadd.f32 %v581_v6, %v503_v3 }
 0x3cb   :  { %v584_v8 = vsub.f32 0.0, %v580_v5 }
 0x3cc   :  { %v585_v9 = vsub.f32 0.0, %v582_v7 }
 0x3cd   :  { %v586_v10 = vmul.f32 1.442695, %v584_v8 }
 0x3ce   :  { %v588_v11 = vmul.f32 1.442695, %v585_v9 }
 0x3cf   :  { %785 = vpow2.f32 %v586_v10 }
 0x3d0   :  { %787 = vpow2.f32 %v588_v11 }
 0x3d9   :  { %v786_v12 = vpop.eup %785 }
 0x3da   :  { %v788_v13 = vpop.eup %787  ;;  %v590_v14 = vadd.f32 1.0, %v786_v12 }
 0x3db   :  { %v591_v15 = vadd.f32 1.0, %v788_v13 }
 0x3dc   :  { %789 = vrcp.f32 %v590_v14 }
 0x3dd   :  { %791 = vrcp.f32 %v591_v15 }
 0x3e6   :  { %v790_v19 = vpop.eup %789 }
 0x3e7   :  { %v792_v21 = vpop.eup %791 }
 0x3e8   :  { %v596_v22 = vcombine.low %v790_v19, %v792_v21 }
 0x3ea   :  { %v603_v23 = vrot.slane %v596_v22, %v602_v20 }
 0x3ec   :  { %v610_v24 = vrot.slane %v603_v23, %v602_v20 }
 0x3ee   :  { %616 = vst.msk [vmem:[#allocation3] sm:$0x3] %vm614_vm6, %v610_v24 }
 0x3ef   :  { %804 = shalt.err (!%p801_p4)
}
 0x3f0   :  { %s805_s29 = scalar_lea.hbm %s1099_s9, 32 }
 0x3f1   :  { %p806_p5 = scmp.ne.s32.totalorder %s1099_s9, %s805_s29  ;;  %p809_p6 = scmp.lt.u32.totalorder %s805_s29, %s1099_s9 }
 0x3f3   :  { %p811_p7 = pnand %p809_p6, %p806_p5 }
 0x3f5   :  { %814 = shalt.err (!%p811_p7)
}
 0x3f6   :  { %626 = dma.vmem_to_hbm [thread:$0]  %s624_s26, 32, %s1099_s9, [#allocation4]  }
 0x3f7   :  { %815 = dma.done.wait [#allocation4], 32  }
 0x3f8   :  { %816 = vsyncadd [#allocation4], 4294967264 }
 0x3f9   :  { %630 = vsyncpa [#allocation4], 1 }

</bundles_post_ra>
